<compile_context>
chip_gen: v7x
topology: tpu7x:2x2x1
jax: 0.10.0
libtpu: 0.0.40
codegen_flags: <defaults>
</compile_context>

<pallas_src>
import jax
import jax.numpy as jnp
from jax.experimental import pallas as pl
from jax.experimental.pallas import tpu as pltpu

FILTER_ORDER = 6
# 'smooth' init filter pattern (deterministic init of the learnable coeffs)
SMOOTH_COEFFS = [1.0, -0.5, 0.1, -0.02, 0.004, -0.0008, 0.00015]
LANES = 128
SUBLANES = 8
DEFAULT_MAX_BLOCK_ROWS = 2048   # (2048, 128) f32 = 1 MiB per pipelined buffer
DEFAULT_MIN_PALLAS_N = 2048     # below this, fused XLA beats a pallas_call launch


def _round_up(a, m):
    return ((a + m - 1) // m) * m


def _cdiv(a, b):
    return -(-a // b)


def _jacobi_recurrence_constants(alpha, beta, order):
    """(A_n, B_n, C_n) = (a2/a1, a3/a1, a4/a1) for n = 2..order, trace-time floats."""
    consts = []
    for n in range(2, order + 1):
        nf = float(n)
        a1 = 2.0 * nf * (nf + alpha + beta) * (2.0 * nf + alpha + beta - 2.0)
        a2 = (2.0 * nf + alpha + beta - 1.0) * (alpha * alpha - beta * beta)
        a3 = (2.0 * nf + alpha + beta - 1.0) * (2.0 * nf + alpha + beta) * \
             (2.0 * nf + alpha + beta - 2.0)
        a4 = 2.0 * (nf + alpha - 1.0) * (nf + beta - 1.0) * (2.0 * nf + alpha + beta)
        inv_a1 = 1.0 / a1
        consts.append((a2 * inv_a1, a3 * inv_a1, a4 * inv_a1))
    return consts


def _make_jacobi_kernel(alpha, beta, order):
    # P_1 = p1_a + p1_b * x ; P_n = (A_n + B_n x) P_{n-1} - C_n P_{n-2}
    p1_a = 0.5 * (alpha - beta)
    p1_b = 0.5 * (alpha + beta + 2.0)
    rec = _jacobi_recurrence_constants(alpha, beta, order)

    def kernel(coeffs_ref, params_ref, eig_ref, out_ref):
        # coeffs_ref: SMEM f32[order+1]  (learnable filter coefficients)
        # params_ref: SMEM f32[2] = [c1, c0]  (folded domain affine)
        # eig_ref / out_ref: VMEM f32[block_rows, 128]
        c1 = params_ref[0]
        c0 = params_ref[1]
        x = jnp.clip(eig_ref[...] * c1 + c0, -0.99, 0.99)

        def phi1():
            # P_1(x); the p1_a term vanishes for alpha == beta (default 0, 0).
            return (p1_a + p1_b * x) if p1_a != 0.0 else p1_b * x

        if order == 0:
            resp = jnp.zeros_like(x) + coeffs_ref[0]
        elif order == 1:
            resp = coeffs_ref[0] + coeffs_ref[1] * phi1()
        else:
            # Clenshaw backward recurrence, fully unrolled; constants are
            # trace-time floats, learnable coeffs are runtime SMEM scalars.
            #   b_k = a_k + (A_{k+1} + B_{k+1} x) b_{k+1} - C_{k+2} b_{k+2}
            #   S   = a_0 + P_1(x) b_1 - C_2 b_2
            A_o, B_o, _ = rec[order - 2]                     # A_order, B_order
            b_top = coeffs_ref[order]                        # b_order (scalar)
            s = coeffs_ref[order - 1]
            if A_o != 0.0:
                s = s + A_o * b_top                          # scalar path
            b_kp1 = s + (B_o * b_top) * x                    # b_{order-1}
            b_kp2 = b_top                                    # still a scalar
            b_kp2_is_scalar = True
            for k in range(order - 2, 0, -1):
                A_k1, B_k1, _ = rec[k - 1]                   # A_{k+1}, B_{k+1}
                C_k2 = rec[k][2]                             # C_{k+2}
                t = ((A_k1 + B_k1 * x) if A_k1 != 0.0 else (B_k1 * x)) * b_kp1
                if b_kp2_is_scalar:
                    b_k = (coeffs_ref[k] - C_k2 * b_kp2) + t   # scalar fold
                else:
                    b_k = (coeffs_ref[k] + t) - C_k2 * b_kp2
                b_kp2, b_kp1 = b_kp1, b_k
                b_kp2_is_scalar = False
            C_2 = rec[0][2]
            if b_kp2_is_scalar:     # order == 2
                resp = (coeffs_ref[0] - C_2 * b_kp2) + phi1() * b_kp1
            else:
                resp = (coeffs_ref[0] + phi1() * b_kp1) - C_2 * b_kp2

        out_ref[...] = jax.nn.sigmoid(resp) + 1e-6

    return kernel


def _jacobi_response_jnp(x, coeffs, alpha, beta, order):
    """Small-N fallback: direct recurrence in plain jnp (XLA fuses the chain)."""
    polys = [jnp.ones_like(x)]
    if order >= 1:
        polys.append(0.5 * (alpha - beta + (alpha + beta + 2.0) * x))
    rec = _jacobi_recurrence_constants(alpha, beta, order)
    for A_n, B_n, C_n in rec:
        polys.append((A_n + B_n * x) * polys[-1] - C_n * polys[-2])
    resp = sum(coeffs[k] * polys[k] for k in range(order + 1))
    return jax.nn.sigmoid(resp) + 1e-6


def jacobi_spectral_filter(eigenvalues, coefficients, domain_scale, domain_shift,
                           alpha=0.0, beta=0.0, *,
                           filter_order=FILTER_ORDER,
                           max_eigenvalue=None,
                           max_block_rows=DEFAULT_MAX_BLOCK_ROWS,
                           min_pallas_n=DEFAULT_MIN_PALLAS_N,
                           force_pallas=False):
    """Wrapper: eigenvalues f32[N] -> filter_response f32[N]."""
    n = eigenvalues.shape[0]
    eig = eigenvalues.astype(jnp.float32)
    coeffs = coefficients.astype(jnp.float32)
    assert coeffs.shape[0] == filter_order + 1

    # PyTorch forward reads alpha/beta via .item(): bake them in at trace time.
    alpha = float(alpha)
    beta = float(beta)

    # Scalar prologue (learnable params stay runtime scalars; one fused affine).
    # Pass max_eigenvalue when the spectrum is fixed across training steps to
    # hoist the max-reduce out of the per-step path.
    scale = jnp.abs(jnp.asarray(domain_scale, jnp.float32)) + 0.1
    shift = jnp.tanh(jnp.asarray(domain_shift, jnp.float32))
    if max_eigenvalue is None:
        max_eigenvalue = jnp.max(eig)
    max_eig = jnp.asarray(max_eigenvalue, jnp.float32) + 1e-8
    c1 = 2.0 * scale / max_eig          # exact scalar divide (not approx reciprocal)
    c0 = shift - scale

    if n < min_pallas_n and not force_pallas:
        # Tiny spectrum: pallas_call launch + pad/slice overhead cannot win.
        x = jnp.clip(eig * c1 + c0, -0.99, 0.99)
        return _jacobi_response_jnp(x, coeffs, alpha, beta, filter_order)

    params = jnp.stack([c1, c0]).astype(jnp.float32)

    # Sublane-dense packing: [N] -> [rows, 128], rows a multiple of 8.
    # Block size derived from the data so block_rows divides rows exactly
    # (no ragged boundary block) and padding stays within a few (8,128) tiles.
    # At least 2 blocks once there are >= 16 rows so the "parallel" grid axis
    # can shard across v7x's two TensorCores.
    rows8 = _round_up(max(_cdiv(n, LANES), 1), SUBLANES)
    num_blocks = max(_cdiv(rows8, max_block_rows),
                     2 if rows8 >= 2 * SUBLANES else 1)
    block_rows = _round_up(_cdiv(rows8, num_blocks), SUBLANES)
    num_blocks = _cdiv(rows8, block_rows)
    rows = num_blocks * block_rows
    n_pad = rows * LANES

    # Pad with 0: the max was taken on the unpadded data, padded lanes are sliced off.
    eig_flat = eig if n_pad == n else jnp.pad(eig, (0, n_pad - n))
    eig2d = eig_flat.reshape(rows, LANES)

    out2d = pl.pallas_call(
        _make_jacobi_kernel(alpha, beta, filter_order),
        grid=(num_blocks,),
        out_shape=jax.ShapeDtypeStruct((rows, LANES), jnp.float32),
        in_specs=[
            pl.BlockSpec(memory_space=pltpu.MemorySpace.SMEM),    # coefficients
            pl.BlockSpec(memory_space=pltpu.MemorySpace.SMEM),    # [c1, c0]
            pl.BlockSpec((block_rows, LANES), lambda i: (i, 0)),  # eigenvalues
        ],
        out_specs=pl.BlockSpec((block_rows, LANES), lambda i: (i, 0)),
        compiler_params=pltpu.CompilerParams(dimension_semantics=("parallel",)),
    )(coeffs, params, eig2d)

    out = out2d.reshape(n_pad)
    return out if n_pad == n else out[:n]


def _reference(eigenvalues, coefficients, domain_scale, domain_shift, alpha, beta):
    """Pure-JAX reference mirroring the PyTorch forward exactly (runtime a1 divide)."""
    scale = jnp.abs(jnp.asarray(domain_scale, jnp.float32)) + 0.1
    shift = jnp.tanh(jnp.asarray(domain_shift, jnp.float32))
    max_eig = jnp.max(eigenvalues) + 1e-8
    x = jnp.clip(scale * (2.0 * (eigenvalues / max_eig) - 1.0) + shift, -0.99, 0.99)
    a = float(alpha)
    b = float(beta)
    polys = [jnp.ones_like(x), 0.5 * (a - b + (a + b + 2.0) * x)]
    for n in range(2, FILTER_ORDER + 1):
        a1 = 2 * n * (n + a + b) * (2 * n + a + b - 2)
        a2 = (2 * n + a + b - 1) * (a ** 2 - b ** 2)
        a3 = (2 * n + a + b - 1) * (2 * n + a + b) * (2 * n + a + b - 2)
        a4 = 2 * (n + a - 1) * (n + b - 1) * (2 * n + a + b)
        polys.append(((a2 + a3 * x) * polys[-1] - a4 * polys[-2]) / a1)
    P = jnp.stack(polys, axis=-1)
    resp = jnp.sum(coefficients[None, :] * P, axis=-1)
    return jax.nn.sigmoid(resp) + 1e-6


if __name__ == "__main__":
    key = jax.random.PRNGKey(0)
    k1, k2, k3 = jax.random.split(key, 3)

    # Deterministic parameter init matching the module's __init__:
    coefficients = jnp.asarray(SMOOTH_COEFFS, dtype=jnp.float32)  # learnable coeffs
    domain_scale = jnp.float32(1.0)
    domain_shift = jnp.float32(0.0)

    # Case 1: small spectrum, Pallas path forced (single (8,128) block), alpha=beta=0.
    N1 = 256
    eig1 = jax.random.uniform(k1, (N1,), dtype=jnp.float32, minval=0.0, maxval=2.0)
    out1 = jax.block_until_ready(
        jacobi_spectral_filter(eig1, coefficients, domain_scale, domain_shift,
                               0.0, 0.0, force_pallas=True))
    ref1 = _reference(eig1, coefficients, domain_scale, domain_shift, 0.0, 0.0)
    assert out1.shape == (N1,)
    assert jnp.allclose(out1, ref1, atol=1e-5, rtol=1e-5)

    # Case 2: larger spectrum -> 2 blocks of (16,128) on the "parallel" grid axis.
    N2 = 4000
    eig2 = jax.random.uniform(k2, (N2,), dtype=jnp.float32, minval=0.0, maxval=5.0)
    out2 = jax.block_until_ready(
        jacobi_spectral_filter(eig2, coefficients, domain_scale, domain_shift, 0.0, 0.0))
    ref2 = _reference(eig2, coefficients, domain_scale, domain_shift, 0.0, 0.0)
    assert out2.shape == (N2,)
    assert jnp.allclose(out2, ref2, atol=1e-5, rtol=1e-5)

    # Case 3: nonzero alpha/beta + nonzero domain params (exercises the A_n != 0 terms).
    N3 = 512
    eig3 = jax.random.uniform(k3, (N3,), dtype=jnp.float32, minval=0.0, maxval=3.0)
    out3 = jax.block_until_ready(
        jacobi_spectral_filter(eig3, coefficients, jnp.float32(0.7), jnp.float32(0.2),
                               0.5, -0.25, force_pallas=True))
    ref3 = _reference(eig3, coefficients, jnp.float32(0.7), jnp.float32(0.2), 0.5, -0.25)
    assert out3.shape == (N3,)
    assert jnp.allclose(out3, ref3, atol=1e-5, rtol=1e-5)

    # Case 4: small-N fused-jnp fallback (no kernel launch), same semantics.
    out4 = jax.block_until_ready(
        jacobi_spectral_filter(eig1, coefficients, domain_scale, domain_shift, 0.0, 0.0))
    assert out4.shape == (N1,)
    assert jnp.allclose(out4, ref1, atol=1e-5, rtol=1e-5)

    print("KERNEL_OK")
</pallas_src>

<mosaic_0001>
module attributes {stable_mosaic.version = 11 : i64} {
  func.func @kernel(%arg0: i32, %arg1: memref<7xf32, #tpu.memory_space<smem>>, %arg2: memref<2xf32, #tpu.memory_space<smem>>, %arg3: memref<8x128xf32, #tpu.memory_space<vmem>>, %arg4: memref<8x128xf32, #tpu.memory_space<vmem>>) attributes {dimension_semantics = [#tpu.dimension_semantics<parallel>], iteration_bounds = array<i64: 1>, scalar_prefetch = 0 : i64, scratch_operands = 0 : i64, tpu.core_type = #tpu.core_type<tc>, window_params = [{transform_indices = @transform_0, window_bounds = array<i64: 7>}, {transform_indices = @transform_1, window_bounds = array<i64: 2>}, {transform_indices = @transform_2, window_bounds = array<i64: 8, 128>}, {transform_indices = @transform_3, window_bounds = array<i64: 8, 128>}]} {
    %c0 = arith.constant 0 : index
    %0 = memref.load %arg2[%c0] : memref<2xf32, #tpu.memory_space<smem>>
    %c1 = arith.constant 1 : index
    %1 = memref.load %arg2[%c1] : memref<2xf32, #tpu.memory_space<smem>>
    %c0_0 = arith.constant 0 : index
    %c0_1 = arith.constant 0 : index
    %2 = vector.load %arg3[%c0_0, %c0_1] : memref<8x128xf32, #tpu.memory_space<vmem>>, vector<8x128xf32>
    %3 = vector.broadcast %0 : f32 to vector<8x128xf32>
    %4 = arith.mulf %2, %3 : vector<8x128xf32>
    %5 = vector.broadcast %1 : f32 to vector<8x128xf32>
    %6 = arith.addf %4, %5 : vector<8x128xf32>
    %cst = arith.constant -9.900000e-01 : f32
    %cst_2 = arith.constant 9.900000e-01 : f32
    %7 = vector.broadcast %cst : f32 to vector<8x128xf32>
    %8 = arith.maximumf %7, %6 : vector<8x128xf32>
    %9 = vector.broadcast %cst_2 : f32 to vector<8x128xf32>
    %10 = arith.minimumf %9, %8 : vector<8x128xf32>
    %c6 = arith.constant 6 : index
    %11 = memref.load %arg1[%c6] : memref<7xf32, #tpu.memory_space<smem>>
    %c5 = arith.constant 5 : index
    %12 = memref.load %arg1[%c5] : memref<7xf32, #tpu.memory_space<smem>>
    %cst_3 = arith.constant 1.83333337 : f32
    %13 = arith.mulf %cst_3, %11 : f32
    %14 = vector.broadcast %13 : f32 to vector<8x128xf32>
    %15 = arith.mulf %14, %10 : vector<8x128xf32>
    %16 = vector.broadcast %12 : f32 to vector<8x128xf32>
    %17 = arith.addf %16, %15 : vector<8x128xf32>
    %cst_4 = arith.constant 1.800000e+00 : f32
    %18 = vector.broadcast %cst_4 : f32 to vector<8x128xf32>
    %19 = arith.mulf %18, %10 : vector<8x128xf32>
    %20 = arith.mulf %19, %17 : vector<8x128xf32>
    %c4 = arith.constant 4 : index
    %21 = memref.load %arg1[%c4] : memref<7xf32, #tpu.memory_space<smem>>
    %cst_5 = arith.constant 0.833333313 : f32
    %22 = arith.mulf %cst_5, %11 : f32
    %23 = arith.subf %21, %22 : f32
    %24 = vector.broadcast %23 : f32 to vector<8x128xf32>
    %25 = arith.addf %24, %20 : vector<8x128xf32>
    %cst_6 = arith.constant 1.750000e+00 : f32
    %26 = vector.broadcast %cst_6 : f32 to vector<8x128xf32>
    %27 = arith.mulf %26, %10 : vector<8x128xf32>
    %28 = arith.mulf %27, %25 : vector<8x128xf32>
    %c3 = arith.constant 3 : index
    %29 = memref.load %arg1[%c3] : memref<7xf32, #tpu.memory_space<smem>>
    %30 = vector.broadcast %29 : f32 to vector<8x128xf32>
    %31 = arith.addf %30, %28 : vector<8x128xf32>
    %cst_7 = arith.constant 8.000000e-01 : f32
    %32 = vector.broadcast %cst_7 : f32 to vector<8x128xf32>
    %33 = arith.mulf %32, %17 : vector<8x128xf32>
    %34 = arith.subf %31, %33 : vector<8x128xf32>
    %cst_8 = arith.constant 1.66666663 : f32
    %35 = vector.broadcast %cst_8 : f32 to vector<8x128xf32>
    %36 = arith.mulf %35, %10 : vector<8x128xf32>
    %37 = arith.mulf %36, %34 : vector<8x128xf32>
    %c2 = arith.constant 2 : index
    %38 = memref.load %arg1[%c2] : memref<7xf32, #tpu.memory_space<smem>>
    %39 = vector.broadcast %38 : f32 to vector<8x128xf32>
    %40 = arith.addf %39, %37 : vector<8x128xf32>
    %cst_9 = arith.constant 7.500000e-01 : f32
    %41 = vector.broadcast %cst_9 : f32 to vector<8x128xf32>
    %42 = arith.mulf %41, %25 : vector<8x128xf32>
    %43 = arith.subf %40, %42 : vector<8x128xf32>
    %cst_10 = arith.constant 1.500000e+00 : f32
    %44 = vector.broadcast %cst_10 : f32 to vector<8x128xf32>
    %45 = arith.mulf %44, %10 : vector<8x128xf32>
    %46 = arith.mulf %45, %43 : vector<8x128xf32>
    %c1_11 = arith.constant 1 : index
    %47 = memref.load %arg1[%c1_11] : memref<7xf32, #tpu.memory_space<smem>>
    %48 = vector.broadcast %47 : f32 to vector<8x128xf32>
    %49 = arith.addf %48, %46 : vector<8x128xf32>
    %cst_12 = arith.constant 0.666666686 : f32
    %50 = vector.broadcast %cst_12 : f32 to vector<8x128xf32>
    %51 = arith.mulf %50, %34 : vector<8x128xf32>
    %52 = arith.subf %49, %51 : vector<8x128xf32>
    %c0_13 = arith.constant 0 : index
    %53 = memref.load %arg1[%c0_13] : memref<7xf32, #tpu.memory_space<smem>>
    %cst_14 = arith.constant 1.000000e+00 : f32
    %54 = vector.broadcast %cst_14 : f32 to vector<8x128xf32>
    %55 = arith.mulf %54, %10 : vector<8x128xf32>
    %56 = arith.mulf %55, %52 : vector<8x128xf32>
    %57 = vector.broadcast %53 : f32 to vector<8x128xf32>
    %58 = arith.addf %57, %56 : vector<8x128xf32>
    %cst_15 = arith.constant 5.000000e-01 : f32
    %59 = vector.broadcast %cst_15 : f32 to vector<8x128xf32>
    %60 = arith.mulf %59, %43 : vector<8x128xf32>
    %61 = arith.subf %58, %60 : vector<8x128xf32>
    %62 = arith.negf %61 : vector<8x128xf32>
    %63 = math.exp %62 : vector<8x128xf32>
    %cst_16 = arith.constant 1.000000e+00 : f32
    %64 = vector.broadcast %cst_16 : f32 to vector<8x128xf32>
    %65 = arith.addf %64, %63 : vector<8x128xf32>
    %66 = arith.divf %64, %65 : vector<8x128xf32>
    %cst_17 = arith.constant 9.99999997E-7 : f32
    %67 = vector.broadcast %cst_17 : f32 to vector<8x128xf32>
    %68 = arith.addf %66, %67 : vector<8x128xf32>
    %c0_18 = arith.constant 0 : index
    %c0_19 = arith.constant 0 : index
    %69 = vector.load %arg4[%c0_18, %c0_19] : memref<8x128xf32, #tpu.memory_space<vmem>>, vector<8x128xf32>
    tpu.vector_store %arg4[%c0_18, %c0_19], %68 {strides = array<i32>} : memref<8x128xf32, #tpu.memory_space<vmem>>, vector<8x128xf32>,
    return
  }
  func.func @transform_0(%arg0: i32) -> i32 {
    %c0_i32 = arith.constant 0 : i32
    %c0_i32_0 = arith.constant 0 : i32
    return %c0_i32 : i32
  }
  func.func @transform_1(%arg0: i32) -> i32 {
    %c0_i32 = arith.constant 0 : i32
    %c0_i32_0 = arith.constant 0 : i32
    return %c0_i32 : i32
  }
  func.func @transform_2(%arg0: i32) -> (i32, i32) {
    %c0_i32 = arith.constant 0 : i32
    %c0_i32_0 = arith.constant 0 : i32
    return %arg0, %c0_i32 : i32, i32
  }
  func.func @transform_3(%arg0: i32) -> (i32, i32) {
    %c0_i32 = arith.constant 0 : i32
    %c0_i32_0 = arith.constant 0 : i32
    return %arg0, %c0_i32 : i32, i32
  }
}

</mosaic_0001>

<bundles_post_ra>
// kernel: tpu_custom_call.1
= control target key start
LH: loop header
LB: loop body
LE: loop exit
PB: predicated region body
PF: predicated region fallthrough
CT: control target
= control target key end

     0   :  { %8 = vsyncpa [#allocation5], 0  ;;  %s279_s0 = inlined_call_operand.hbm [shape: f32[7], index: 0, kind: input, shape index: {}]   ;;  %s280_s1 = inlined_call_operand.vmem [shape: f32[2], index: 1, kind: input, shape index: {}]   ;;  %s281_s2 = inlined_call_operand.hbm [shape: f32[8,128], index: 2, kind: input, shape index: {}]   ;;  %s282_s3 = inlined_call_operand.hbm [shape: f32[8,128], index: 3, kind: output, shape index: {}]  }
   0x1   :  { %9 = vsyncpa [#allocation6], 0 }
   0x2   :  { %10 = vsyncpa [#allocation3], 0 }
   0x3   :  { %11 = vsyncpa [#allocation4], 0  ;;  %s26_s14 = sshll.u32 %s280_s1, 4  ;;  %s142_s17 = scalar_lea.hbm %s279_s0, 16  ;;  %s27_s14 = int_to_ptr.vmem [resolvable:$true] %s26_s14 }
   0x4   :  { %p143_p0 = scmp.ne.s32.totalorder %s279_s0, %s142_s17  ;;  %p146_p1 = scmp.lt.u32.totalorder %s142_s17, %s279_s0 }
   0x6   :  { %p148_p2 = pnand %p146_p1, %p143_p0 }
   0x8   :  { %151 = shalt.err (!%p148_p2)
}
   0x9   :  { %s216_s22 = smov [#allocation2]   ;;  %s152_s1 = scalar_lea.vmem %s27_s14, 16 }
   0xa   :  { %19 = dma.hbm_to_smem %s279_s0, 16, %s216_s22, [#allocation5]  }
   0xb   :  { %p153_p3 = scmp.ne.s32.totalorder %s27_s14, %s152_s1  ;;  %p157_p4 = scmp.lt.s32.totalorder %s27_s14, %s27_s14 }
   0xc   :  { %p158_p5 = scmp.lt.s32.totalorder %s152_s1, %s152_s1 }
   0xe   :  { %p159_p6 = por %p158_p5, %p157_p4 }
  0x10   :  { %p160_p7 = pnand %p159_p6, %p153_p3 }
  0x12   :  { %163 = shalt.err (!%p160_p7)
}
  0x13   :  { %s217_s25 = smov [#allocation7]   ;;  %s218_s26 = smov [#allocation8]  }
  0x14   :  { %29 = dma.vmem_to_smem %s27_s14, 16, %s217_s25, [#allocation6]  }
  0x15   :  { %s36_s27 = sshll.u32 %s218_s26, 4  ;;  %s164_s30 = scalar_lea.hbm %s281_s2, 128  ;;  %s37_s27 = int_to_ptr.vmem [resolvable:$true] %s36_s27 }
  0x16   :  { %p165_p8 = scmp.ne.s32.totalorder %s281_s2, %s164_s30  ;;  %p168_p9 = scmp.lt.u32.totalorder %s164_s30, %s281_s2 }
  0x18   :  { %p170_p10 = pnand %p168_p9, %p165_p8 }
  0x1a   :  { %173 = shalt.err (!%p170_p10)
}
  0x1b   :  { %s174_s7 = scalar_lea.vmem %s37_s27, 128  ;;  %p179_p12 = scmp.lt.s32.totalorder %s37_s27, %s37_s27 }
  0x1c   :  { %p175_p11 = scmp.ne.s32.totalorder %s37_s27, %s174_s7  ;;  %p180_p13 = scmp.lt.s32.totalorder %s174_s7, %s174_s7 }
  0x1e   :  { %p181_p0 = por %p180_p13, %p179_p12 }
  0x20   :  { %p182_p1 = pnand %p181_p0, %p175_p11 }
  0x22   :  { %185 = shalt.err (!%p182_p1)
}
  0x23   :  { %39 = dma.hbm_to_vmem [thread:$0]  %s281_s2, 128, %s37_s27, [#allocation3]  }
  0x24   :  { %208 = dma.done.wait [#allocation5], 16  }
  0x25   :  { %209 = vsyncadd [#allocation5], 4294967280 }
  0x26   :  { %210 = dma.done.wait [#allocation6], 16  }
  0x27   :  { %211 = vsyncadd [#allocation6], 4294967280 }
  0x28   :  { %212 = dma.done.wait [#allocation3], 128  }
  0x29   :  { %213 = vsyncadd [#allocation3], 4294967168 }
  0x2a   :  { %49 = sfence }
  0x2b   :  { %s50_s10 = sld [smem:[#allocation7]]  ;;  %s125_s11 = sld [smem:[#allocation7 + $0x1]]  ;;  %v52_v0 = vld [vmem:[#allocation8] sm:$0xff] }
  0x2c   :  { %s127_s12 = sld [smem:[#allocation2 + $0x6]]  ;;  %s128_s13 = sld [smem:[#allocation2 + $0x5]] }
  0x2d   :  { %s129_s14 = sld [smem:[#allocation2 + $0x4]]  ;;  %s130_s17 = sld [smem:[#allocation2 + $0x3]] }
  0x2e   :  { %s131_s18 = sld [smem:[#allocation2 + $0x2]]  ;;  %s132_s19 = sld [smem:[#allocation2 + $0x1]] }
  0x2f   :  { %s94_s20 = sld [smem:[#allocation2]]  ;;  %s219_s21 = smov [#allocation9]  }
  0x30   :  { %s114_s22 = sshll.u32 %s219_s21, 4  ;;  %s115_s22 = int_to_ptr.vmem [resolvable:$true] %s114_s22 }
  0x31   :  { %v53_v1 = vstv %s50_s10  ;;  %v55_v2 = vstv %s125_s11  ;;  %s186_s23 = scalar_lea.vmem %s115_s22, 128  ;;  %p191_p3 = scmp.lt.s32.totalorder %s115_s22, %s115_s22 }
  0x32   :  { %v54_v3 = vmul.f32 %v53_v1, %v52_v0  ;;  %s61_s15 = smul.f32 1.8333334, %s127_s12  ;;  %v64_v7 = vstv %s128_s13  ;;  %p187_p2 = scmp.ne.s32.totalorder %s115_s22, %s186_s23 }
  0x33   :  { %s69_s16 = smul.f32 0.8333333, %s127_s12  ;;  %v76_v15 = vstv %s130_s17  ;;  %p192_p4 = scmp.lt.s32.totalorder %s186_s23, %s186_s23 }
  0x34   :  { %v56_v4 = vadd.f32 %v55_v2, %v54_v3  ;;  %v62_v5 = vstv %s61_s15  ;;  %v83_v21 = vstv %s131_s18  ;;  %v90_v27 = vstv %s132_s19 }
  0x35   :  { %s70_s2 = ssub.f32 %s129_s14, %s69_s16  ;;  %v96_v32 = vstv %s94_s20  ;;  %p193_p5 = por %p192_p4, %p191_p3 }
  0x36   :  { %v126_v6 = vclamps-f32 %v56_v4, 0.99 }
  0x37   :  { %v71_v11 = vstv %s70_s2  ;;  %p194_p6 = pnand %p193_p5, %p187_p2 }
  0x38   :  { %v63_v8 = vmul.f32 %v126_v6, %v62_v5  ;;  %v66_v9 = vmul.f32 1.8, %v126_v6  ;;  %v73_v13 = vmul.f32 1.75, %v126_v6  ;;  %v80_v19 = vmul.f32 1.6666666, %v126_v6 }
  0x39   :  { %v87_v25 = vmul.f32 1.5, %v126_v6 }
  0x3a   :  { %v65_v10 = vadd.f32 %v64_v7, %v63_v8 }
  0x3c   :  { %v67_v12 = vmul.f32 %v66_v9, %v65_v10  ;;  %v78_v17 = vmul.f32 0.8, %v65_v10 }
  0x3e   :  { %v72_v14 = vadd.f32 %v71_v11, %v67_v12 }
  0x40   :  { %v74_v16 = vmul.f32 %v73_v13, %v72_v14  ;;  %v85_v23 = vmul.f32 0.75, %v72_v14 }
  0x42   :  { %v77_v18 = vadd.f32 %v76_v15, %v74_v16 }
  0x44   :  { %v79_v20 = vsub.f32 %v77_v18, %v78_v17 }
  0x46   :  { %v81_v22 = vmul.f32 %v80_v19, %v79_v20  ;;  %v92_v29 = vmul.f32 0.6666667, %v79_v20 }
  0x48   :  { %v84_v24 = vadd.f32 %v83_v21, %v81_v22 }
  0x4a   :  { %v86_v26 = vsub.f32 %v84_v24, %v85_v23 }
  0x4c   :  { %v88_v28 = vmul.f32 %v87_v25, %v86_v26  ;;  %v98_v34 = vmul.f32 0.5, %v86_v26 }
  0x4e   :  { %v91_v30 = vadd.f32 %v90_v27, %v88_v28 }
  0x50   :  { %v93_v31 = vsub.f32 %v91_v30, %v92_v29 }
  0x52   :  { %v95_v33 = vmul.f32 %v126_v6, %v93_v31 }
  0x54   :  { %v97_v35 = vadd.f32 %v96_v32, %v95_v33 }
  0x56   :  { %v99_v36 = vsub.f32 %v97_v35, %v98_v34 }
  0x58   :  { %v133_v37 = vmul.f32 -1.442695, %v99_v36 }
  0x5a   :  { %138 = vpow2.f32 %v133_v37 }
  0x64   :  { %v139_v38 = vpop.eup %138 }
  0x65   :  { %v103_v39 = vadd.f32 1.0, %v139_v38 }
  0x67   :  { %140 = vrcp.f32 %v103_v39 }
  0x71   :  { %v141_v40 = vpop.eup %140 }
  0x72   :  { %v106_v41 = vadd.f32 1e-06, %v141_v40 }
  0x74   :  { %107 = vst [vmem:[#allocation9] sm:$0xff] %v106_v41 }
  0x75   :  { %197 = shalt.err (!%p194_p6)
}
  0x76   :  { %s198_s25 = scalar_lea.hbm %s282_s3, 128 }
  0x77   :  { %p199_p7 = scmp.ne.s32.totalorder %s282_s3, %s198_s25  ;;  %p202_p8 = scmp.lt.u32.totalorder %s198_s25, %s282_s3 }
  0x79   :  { %p204_p9 = pnand %p202_p8, %p199_p7 }
  0x7b   :  { %207 = shalt.err (!%p204_p9)
}
  0x7c   :  { %117 = dma.vmem_to_hbm [thread:$0]  %s115_s22, 128, %s282_s3, [#allocation4]  }
  0x7d   :  { %214 = dma.done.wait [#allocation4], 128  }
  0x7e   :  { %215 = vsyncadd [#allocation4], 4294967168 }
  0x7f   :  { %121 = vsyncpa [#allocation3], 1 }
  0x80   :  { %122 = vsyncpa [#allocation4], 1 }
  0x81   :  { %123 = vsyncpa [#allocation5], 1 }
  0x82   :  { %124 = vsyncpa [#allocation6], 1 }

</bundles_post_ra>
